<compile_context>
chip_gen: v7x
topology: tpu7x:2x2x1
jax: 0.10.0
libtpu: 0.0.40
codegen_flags: <defaults>
</compile_context>

<pallas_src>
import jax
import jax.numpy as jnp
from jax.experimental import pallas as pl
from jax.experimental.pallas import tpu as pltpu

INPUT_SIZE = 64
HIDDEN_SIZE_ = 64
HIDDEN_SIZE = 128
NUM_CLASSES = 1

TILE_B_MAX = 8192      # max batch rows per grid step (~2 MiB f32 x tile)
TILE_B_MIN = 1024      # never shrink tiles below this chasing grid depth
MIN_GRID_STEPS = 8     # >= 4 steps per TC on v7x once B is large


def _round_up(a, m):
    return ((a + m - 1) // m) * m


def _choose_tile_b(B, tile_b_max):
    rows = _round_up(B, 8)
    tile = min(_round_up(tile_b_max, 8), rows)
    # For large B, cap the tile so the grid has >= MIN_GRID_STEPS steps (feeds
    # both v7x TensorCores and keeps the double-buffer pipeline deep), but never
    # below TILE_B_MIN rows (step overhead would dominate again).
    target = _round_up(pl.cdiv(rows, MIN_GRID_STEPS), 8)
    if target >= TILE_B_MIN:
        tile = min(tile, target)
    return max(tile, 8)


def _mlp_kernel(x_ref, w1_ref, b1_ref, w2_ref, b2_ref, w3_ref, b3_ref, o_ref):
    # In-kernel f32 -> bf16 cast of x on the VPU (kernel is HBM-bound, cast is free).
    x = x_ref[...].astype(w1_ref.dtype)

    # fc1: (tb, 64) @ (64, 64) on the MXU, f32 accumulation; bias + ReLU in f32.
    h1 = jnp.dot(x, w1_ref[...], preferred_element_type=jnp.float32)
    h1 = jnp.maximum(h1 + b1_ref[...], 0.0)

    # fc2_: (tb, 64) @ (64, 128) on the MXU (bf16 operands, f32 accumulation).
    h2 = jnp.dot(h1.astype(w2_ref.dtype), w2_ref[...],
                 preferred_element_type=jnp.float32)
    h2 = jnp.maximum(h2 + b2_ref[...], 0.0)

    # fc2 (num_classes == 1): VPU multiply + XLU lane reduction (MXU stays free).
    col = jnp.sum(h2 * w3_ref[...], axis=-1, keepdims=True)          # (tb, 1) f32

    # Lane-dense store: (tb, 1) -> (1, tb) sublane->lane transform on the idle
    # XLU, then one full unmasked row store into the (1, 1, tb) output block.
    row = jnp.transpose(col, (1, 0)) + b3_ref[...]                    # (1, tb)
    o_ref[...] = row[None].astype(o_ref.dtype)                        # (1, 1, tb)


def prepare_params(params, compute_dtype=jnp.bfloat16):
    """One-time param prep (hoisted out of the forward hot path).

    Transposes weights to (in, out), reshapes biases to (1, out) rows, and casts
    the two matmul weights to bf16. Biases and the final weight row stay f32.
    """
    return {
        "w1t": params["w1"].T.astype(compute_dtype),                 # (64, 64)
        "b1": params["b1"].reshape(1, -1).astype(jnp.float32),       # (1, 64)
        "w2t": params["w2"].T.astype(compute_dtype),                 # (64, 128)
        "b2": params["b2"].reshape(1, -1).astype(jnp.float32),       # (1, 128)
        "w3_row": params["w3"].reshape(1, -1).astype(jnp.float32),   # (1, 128)
        "b3": params["b3"].reshape(1, -1).astype(jnp.float32),       # (1, 1)
    }


def mlp_forward(x, prepared, *, tile_b_max=TILE_B_MAX):
    """Fused MLP forward. x: (B, INPUT_SIZE). Returns (B, NUM_CLASSES) f32."""
    B = x.shape[0]
    tile_b = _choose_tile_b(B, tile_b_max)
    grid_b = pl.cdiv(B, tile_b)          # ragged tail -> partial last x block

    # Weights/biases: same block every grid step -> stay VMEM-resident.
    resident = lambda shape: pl.BlockSpec(shape, lambda i: (0, 0))

    out = pl.pallas_call(
        _mlp_kernel,
        out_shape=jax.ShapeDtypeStruct((grid_b, 1, tile_b), jnp.float32),
        grid=(grid_b,),
        in_specs=[
            pl.BlockSpec((tile_b, INPUT_SIZE), lambda i: (i, 0)),   # x tile
            resident((INPUT_SIZE, HIDDEN_SIZE_)),                   # w1t
            resident((1, HIDDEN_SIZE_)),                            # b1
            resident((HIDDEN_SIZE_, HIDDEN_SIZE)),                  # w2t
            resident((1, HIDDEN_SIZE)),                             # b2
            resident((1, HIDDEN_SIZE)),                             # w3 row
            resident((1, NUM_CLASSES)),                             # b3
        ],
        out_specs=pl.BlockSpec((1, 1, tile_b), lambda i: (i, 0, 0)),  # lane-dense
        compiler_params=pltpu.CompilerParams(
            dimension_semantics=("parallel",),       # megacore sharding on v7x
            vmem_limit_bytes=48 * 1024 * 1024,       # budgeted for v7x 64 MiB/TC
        ),
    )(x, prepared["w1t"], prepared["b1"], prepared["w2t"], prepared["b2"],
      prepared["w3_row"], prepared["b3"])

    # Lane-dense (grid_b, 1, tile_b) -> (B, 1); drops the garbage tail from the
    # partial last block. Output traffic is only 4 B/row.
    return out.reshape(-1)[:B].reshape(B, NUM_CLASSES)


def init_params(key):
    """Deterministic init mirroring nn.Linear's default (uniform +- 1/sqrt(fan_in))."""
    ks = jax.random.split(key, 6)

    def linear_init(kw, kb, out_f, in_f):
        bound = 1.0 / jnp.sqrt(in_f)
        w = jax.random.uniform(kw, (out_f, in_f), jnp.float32, -bound, bound)
        b = jax.random.uniform(kb, (out_f,), jnp.float32, -bound, bound)
        return w, b

    w1, b1 = linear_init(ks[0], ks[1], HIDDEN_SIZE_, INPUT_SIZE)
    w2, b2 = linear_init(ks[2], ks[3], HIDDEN_SIZE, HIDDEN_SIZE_)
    w3, b3 = linear_init(ks[4], ks[5], NUM_CLASSES, HIDDEN_SIZE)
    return {"w1": w1, "b1": b1, "w2": w2, "b2": b2, "w3": w3, "b3": b3}


def reference_forward(x, p):
    h1 = jnp.maximum(x @ p["w1"].T + p["b1"], 0.0)
    h2 = jnp.maximum(h1 @ p["w2"].T + p["b2"], 0.0)
    return h2 @ p["w3"].T + p["b3"]


if __name__ == "__main__":
    key = jax.random.PRNGKey(0)
    kx1, kx2, kp = jax.random.split(key, 3)

    params = init_params(kp)
    prepared = prepare_params(params)   # one-time prep, out of the hot path

    # Small smoke test: single tile, B multiple of 8.
    B1 = 8
    x1 = jax.random.normal(kx1, (B1, INPUT_SIZE), jnp.float32)
    out1 = jax.block_until_ready(jax.jit(mlp_forward)(x1, prepared))
    ref1 = reference_forward(x1, params)
    assert out1.shape == (B1, NUM_CLASSES), out1.shape
    err1 = float(jnp.max(jnp.abs(out1 - ref1)))
    assert jnp.allclose(out1, ref1, atol=5e-2, rtol=5e-2), f"max abs diff {err1}"

    # Ragged multi-tile path: cdiv grid, partial last x block, lane-dense output.
    B2 = 300
    x2 = jax.random.normal(kx2, (B2, INPUT_SIZE), jnp.float32)
    small_tile_fwd = jax.jit(lambda xx, pp: mlp_forward(xx, pp, tile_b_max=128))
    out2 = jax.block_until_ready(small_tile_fwd(x2, prepared))
    ref2 = reference_forward(x2, params)
    assert out2.shape == (B2, NUM_CLASSES), out2.shape
    err2 = float(jnp.max(jnp.abs(out2 - ref2)))
    assert jnp.allclose(out2, ref2, atol=5e-2, rtol=5e-2), f"max abs diff {err2}"

    print("KERNEL_OK")
</pallas_src>

<mosaic_0001>
module attributes {stable_mosaic.version = 11 : i64} {
  func.func @_mlp_kernel(%arg0: i32, %arg1: memref<8x64xf32, #tpu.memory_space<vmem>>, %arg2: memref<64x64xbf16, #tpu.memory_space<vmem>>, %arg3: memref<1x64xf32, #tpu.memory_space<vmem>>, %arg4: memref<64x128xbf16, #tpu.memory_space<vmem>>, %arg5: memref<1x128xf32, #tpu.memory_space<vmem>>, %arg6: memref<1x128xf32, #tpu.memory_space<vmem>>, %arg7: memref<1x1xf32, #tpu.memory_space<vmem>>, %arg8: memref<1x1x8xf32, #tpu.memory_space<vmem>>) attributes {dimension_semantics = [#tpu.dimension_semantics<parallel>], iteration_bounds = array<i64: 1>, scalar_prefetch = 0 : i64, scratch_operands = 0 : i64, tpu.core_type = #tpu.core_type<tc>, window_params = [{transform_indices = @transform_0, window_bounds = array<i64: 8, 64>}, {pipeline_mode = #tpu.pipeline_mode<synchronous>, transform_indices = @transform_1, window_bounds = array<i64: 64, 64>}, {pipeline_mode = #tpu.pipeline_mode<synchronous>, transform_indices = @transform_2, window_bounds = array<i64: 1, 64>}, {pipeline_mode = #tpu.pipeline_mode<synchronous>, transform_indices = @transform_3, window_bounds = array<i64: 64, 128>}, {pipeline_mode = #tpu.pipeline_mode<synchronous>, transform_indices = @transform_4, window_bounds = array<i64: 1, 128>}, {pipeline_mode = #tpu.pipeline_mode<synchronous>, transform_indices = @transform_5, window_bounds = array<i64: 1, 128>}, {pipeline_mode = #tpu.pipeline_mode<synchronous>, transform_indices = @transform_6, window_bounds = array<i64: 1, 1>}, {transform_indices = @transform_7, window_bounds = array<i64: 1, 1, 8>}]} {
    %c0 = arith.constant 0 : index
    %c0_0 = arith.constant 0 : index
    %0 = vector.load %arg1[%c0, %c0_0] : memref<8x64xf32, #tpu.memory_space<vmem>>, vector<8x64xf32>
    %1 = arith.truncf %0 : vector<8x64xf32> to vector<8x64xbf16>
    %c0_1 = arith.constant 0 : index
    %c0_2 = arith.constant 0 : index
    %2 = vector.load %arg2[%c0_1, %c0_2] : memref<64x64xbf16, #tpu.memory_space<vmem>>, vector<64x64xbf16>
    %cst = arith.constant dense<0.000000e+00> : vector<8x64xf32>
    %3 = tpu.matmul %1, %2, %cst {dimension_numbers = #tpu.dot_dimension_numbers<[1], [0], [0], [1], [0, 0, 1, 1], [], []>} : vector<8x64xbf16>, vector<64x64xbf16>, vector<8x64xf32> -> vector<8x64xf32>
    %c0_3 = arith.constant 0 : index
    %c0_4 = arith.constant 0 : index
    %4 = vector.load %arg3[%c0_3, %c0_4] : memref<1x64xf32, #tpu.memory_space<vmem>>, vector<1x64xf32>
    %5 = vector.broadcast %4 : vector<1x64xf32> to vector<8x64xf32>
    %6 = arith.addf %3, %5 : vector<8x64xf32>
    %cst_5 = arith.constant 0.000000e+00 : f32
    %7 = vector.broadcast %cst_5 : f32 to vector<8x64xf32>
    %8 = arith.maximumf %6, %7 : vector<8x64xf32>
    %9 = arith.truncf %8 : vector<8x64xf32> to vector<8x64xbf16>
    %c0_6 = arith.constant 0 : index
    %c0_7 = arith.constant 0 : index
    %10 = vector.load %arg4[%c0_6, %c0_7] : memref<64x128xbf16, #tpu.memory_space<vmem>>, vector<64x128xbf16>
    %cst_8 = arith.constant dense<0.000000e+00> : vector<8x128xf32>
    %11 = tpu.matmul %9, %10, %cst_8 {dimension_numbers = #tpu.dot_dimension_numbers<[1], [0], [0], [1], [0, 0, 1, 1], [], []>} : vector<8x64xbf16>, vector<64x128xbf16>, vector<8x128xf32> -> vector<8x128xf32>
    %c0_9 = arith.constant 0 : index
    %c0_10 = arith.constant 0 : index
    %12 = vector.load %arg5[%c0_9, %c0_10] : memref<1x128xf32, #tpu.memory_space<vmem>>, vector<1x128xf32>
    %13 = vector.broadcast %12 : vector<1x128xf32> to vector<8x128xf32>
    %14 = arith.addf %11, %13 : vector<8x128xf32>
    %cst_11 = arith.constant 0.000000e+00 : f32
    %15 = vector.broadcast %cst_11 : f32 to vector<8x128xf32>
    %16 = arith.maximumf %14, %15 : vector<8x128xf32>
    %c0_12 = arith.constant 0 : index
    %c0_13 = arith.constant 0 : index
    %17 = vector.load %arg6[%c0_12, %c0_13] : memref<1x128xf32, #tpu.memory_space<vmem>>, vector<1x128xf32>
    %18 = vector.broadcast %17 : vector<1x128xf32> to vector<8x128xf32>
    %19 = arith.mulf %16, %18 : vector<8x128xf32>
    %cst_14 = arith.constant dense<0.000000e+00> : vector<8xf32>
    %20 = vector.multi_reduction <add>, %19, %cst_14 [1] : vector<8x128xf32> to vector<8xf32>
    %21 = vector.shape_cast %20 : vector<8xf32> to vector<8x1xf32>
    %22 = tpu.transpose %21, [1, 0] : vector<8x1xf32> -> vector<1x8xf32>
    %c0_15 = arith.constant 0 : index
    %c0_16 = arith.constant 0 : index
    %23 = vector.load %arg7[%c0_15, %c0_16] : memref<1x1xf32, #tpu.memory_space<vmem>>, vector<1x1xf32>
    %24 = vector.broadcast %23 : vector<1x1xf32> to vector<1x8xf32>
    %25 = arith.addf %22, %24 : vector<1x8xf32>
    %26 = vector.shape_cast %25 : vector<1x8xf32> to vector<1x1x8xf32>
    %c0_17 = arith.constant 0 : index
    %c0_18 = arith.constant 0 : index
    %c0_19 = arith.constant 0 : index
    %27 = vector.load %arg8[%c0_17, %c0_18, %c0_19] : memref<1x1x8xf32, #tpu.memory_space<vmem>>, vector<1x1x8xf32>
    tpu.vector_store %arg8[%c0_17, %c0_18, %c0_19], %26 {strides = array<i32>} : memref<1x1x8xf32, #tpu.memory_space<vmem>>, vector<1x1x8xf32>,
    return
  }
  func.func @transform_0(%arg0: i32) -> (i32, i32) {
    %c0_i32 = arith.constant 0 : i32
    %c0_i32_0 = arith.constant 0 : i32
    return %arg0, %c0_i32 : i32, i32
  }
  func.func @transform_1(%arg0: i32) -> (i32, i32) {
    %c0_i32 = arith.constant 0 : i32
    %c0_i32_0 = arith.constant 0 : i32
    %c0_i32_1 = arith.constant 0 : i32
    return %c0_i32, %c0_i32_0 : i32, i32
  }
  func.func @transform_2(%arg0: i32) -> (i32, i32) {
    %c0_i32 = arith.constant 0 : i32
    %c0_i32_0 = arith.constant 0 : i32
    %c0_i32_1 = arith.constant 0 : i32
    return %c0_i32, %c0_i32_0 : i32, i32
  }
  func.func @transform_3(%arg0: i32) -> (i32, i32) {
    %c0_i32 = arith.constant 0 : i32
    %c0_i32_0 = arith.constant 0 : i32
    %c0_i32_1 = arith.constant 0 : i32
    return %c0_i32, %c0_i32_0 : i32, i32
  }
  func.func @transform_4(%arg0: i32) -> (i32, i32) {
    %c0_i32 = arith.constant 0 : i32
    %c0_i32_0 = arith.constant 0 : i32
    %c0_i32_1 = arith.constant 0 : i32
    return %c0_i32, %c0_i32_0 : i32, i32
  }
  func.func @transform_5(%arg0: i32) -> (i32, i32) {
    %c0_i32 = arith.constant 0 : i32
    %c0_i32_0 = arith.constant 0 : i32
    %c0_i32_1 = arith.constant 0 : i32
    return %c0_i32, %c0_i32_0 : i32, i32
  }
  func.func @transform_6(%arg0: i32) -> (i32, i32) {
    %c0_i32 = arith.constant 0 : i32
    %c0_i32_0 = arith.constant 0 : i32
    %c0_i32_1 = arith.constant 0 : i32
    return %c0_i32, %c0_i32_0 : i32, i32
  }
  func.func @transform_7(%arg0: i32) -> (i32, i32, i32) {
    %c0_i32 = arith.constant 0 : i32
    %c0_i32_0 = arith.constant 0 : i32
    %c0_i32_1 = arith.constant 0 : i32
    return %arg0, %c0_i32, %c0_i32_0 : i32, i32, i32
  }
}

</mosaic_0001>

<bundles_post_ra>
// kernel: mlp_forward.1
= control target key start
LH: loop header
LB: loop body
LE: loop exit
PB: predicated region body
PF: predicated region fallthrough
CT: control target
= control target key end

     0   :  { %s584_s0 = inlined_call_operand.hbm [shape: f32[8,64], index: 0, kind: input, shape index: {}]   ;;  %s585_s1 = inlined_call_operand.hbm [shape: bf16[64,64], index: 1, kind: input, shape index: {}]   ;;  %s586_s2 = inlined_call_operand.vmem [shape: f32[1,64], index: 2, kind: input, shape index: {}]   ;;  %s587_s3 = inlined_call_operand.hbm [shape: bf16[64,128], index: 3, kind: input, shape index: {}]   ;;  %s588_s4 = inlined_call_operand.vmem [shape: f32[1,128], index: 4, kind: input, shape index: {}]   ;;  %s589_s5 = inlined_call_operand.vmem [shape: f32[1,128], index: 5, kind: input, shape index: {}]   ;;  %s590_s6 = inlined_call_operand.<no memory space> [shape: f32[1,1], index: 6, kind: input, shape index: {}]   ;;  %s591_s7 = inlined_call_operand.hbm [shape: f32[1,1,8], index: 7, kind: output, shape index: {}]  }
   0x1   :  { %v12_v0 = vstv %s590_s6 }
   0x2   :  { %13 = vst [vmem:[#allocation2] sm:$0x1] %v12_v0 }
   0x3   :  { %14 = vsyncpa [#allocation4], 0 }
   0x4   :  { %15 = vsyncpa [#allocation7], 0 }
   0x5   :  { %16 = vsyncpa [#allocation5], 0  ;;  %s469_s26 = smov [#allocation6]   ;;  %s375_s30 = scalar_lea.hbm %s585_s1, 512 }
   0x6   :  { %s32_s27 = sshll.u32 %s469_s26, 4  ;;  %p376_p0 = scmp.ne.s32.totalorder %s585_s1, %s375_s30  ;;  %s33_s27 = int_to_ptr.vmem [resolvable:$true] %s32_s27 }
   0x7   :  { %p379_p1 = scmp.lt.u32.totalorder %s375_s30, %s585_s1 }
   0x9   :  { %p381_p2 = pnand %p379_p1, %p376_p0 }
   0xb   :  { %384 = shalt.err (!%p381_p2)
}
   0xc   :  { %s385_s6 = scalar_lea.vmem %s33_s27, 512  ;;  %p390_p4 = scmp.lt.s32.totalorder %s33_s27, %s33_s27 }
   0xd   :  { %p386_p3 = scmp.ne.s32.totalorder %s33_s27, %s385_s6  ;;  %p391_p5 = scmp.lt.s32.totalorder %s385_s6, %s385_s6 }
   0xf   :  { %p392_p6 = por %p391_p5, %p390_p4 }
  0x11   :  { %p393_p7 = pnand %p392_p6, %p386_p3 }
  0x13   :  { %396 = shalt.err (!%p393_p7)
}
  0x14   :  { %s470_s12 = smov 64   ;;  %s471_s13 = smov 4  }
  0x15   :  { %38 = dma.hbm_to_vmem [thread:$0]  %s585_s1, 512, %s33_s27, [#allocation7], %s470_s12, %s470_s12, %s471_s13  }
  0x16   :  { %s472_s16 = smov [#allocation3]   ;;  %s473_s18 = smov [#allocation8]  }
  0x17   :  { %s23_s17 = sshll.u32 %s472_s16, 4  ;;  %s46_s19 = sshll.u32 %s473_s18, 4  ;;  %s24_s17 = int_to_ptr.vmem [resolvable:$true] %s23_s17  ;;  %s47_s19 = int_to_ptr.vmem [resolvable:$true] %s46_s19 }
  0x18   :  { %s397_s22 = scalar_lea.hbm %s584_s0, 128 }
  0x19   :  { %p398_p8 = scmp.ne.s32.totalorder %s584_s0, %s397_s22  ;;  %p401_p9 = scmp.lt.u32.totalorder %s397_s22, %s584_s0 }
  0x1b   :  { %p403_p10 = pnand %p401_p9, %p398_p8 }
  0x1d   :  { %406 = shalt.err (!%p403_p10)
}
  0x1e   :  { %s407_s1 = scalar_lea.vmem %s24_s17, 128  ;;  %p412_p12 = scmp.lt.s32.totalorder %s24_s17, %s24_s17 }
  0x1f   :  { %p408_p11 = scmp.ne.s32.totalorder %s24_s17, %s407_s1  ;;  %p413_p13 = scmp.lt.s32.totalorder %s407_s1, %s407_s1 }
  0x21   :  { %p414_p0 = por %p413_p13, %p412_p12 }
  0x23   :  { %p415_p1 = pnand %p414_p0, %p408_p11 }
  0x25   :  { %418 = shalt.err (!%p415_p1)
}
  0x26   :  { %26 = dma.hbm_to_vmem [thread:$0]  %s584_s0, 128, %s24_s17, [#allocation4]  }
  0x27   :  { %s419_s8 = scalar_lea.hbm %s587_s3, 512 }
  0x28   :  { %p420_p2 = scmp.ne.s32.totalorder %s587_s3, %s419_s8  ;;  %p423_p3 = scmp.lt.u32.totalorder %s419_s8, %s587_s3 }
  0x2a   :  { %p425_p4 = pnand %p423_p3, %p420_p2 }
  0x2c   :  { %428 = shalt.err (!%p425_p4)
}
  0x2d   :  { %s429_s14 = scalar_lea.vmem %s47_s19, 512  ;;  %p434_p6 = scmp.lt.s32.totalorder %s47_s19, %s47_s19 }
  0x2e   :  { %p430_p5 = scmp.ne.s32.totalorder %s47_s19, %s429_s14  ;;  %p435_p7 = scmp.lt.s32.totalorder %s429_s14, %s429_s14 }
  0x30   :  { %p436_p8 = por %p435_p7, %p434_p6 }
  0x32   :  { %p437_p9 = pnand %p436_p8, %p430_p5 }
  0x34   :  { %440 = shalt.err (!%p437_p9)
}
  0x35   :  { %52 = dma.hbm_to_vmem [thread:$0]  %s587_s3, 512, %s47_s19, [#allocation7], %s470_s12, %s470_s12, %s471_s13  }
  0x36   :  { %463 = dma.done.wait [#allocation4], 128  }
  0x37   :  { %464 = vsyncadd [#allocation4], 4294967168 }
  0x38   :  { %465 = dma.done.wait [#allocation7], 1024  }
  0x39   :  { %466 = vsyncadd [#allocation7], 4294966272  ;;  %v474_v1 = vmov 0.0   ;;  %vm475_vm0 = vmmov 0   ;;  %v367_v2 = vld [vmem:[#allocation6] sm:$0xff]   ;;  %v368_v3 = vld [vmem:[#allocation6 + $0x8] sm:$0xff]   ;;  %v287_v32 = vlaneseq }
  0x3a   :  { %333 = vmatprep.subr.bf16.mxu0 %v474_v1  ;;  %341 = vmatprep.mubr.msk.bf16.mxu0 %vm475_vm0, %v474_v1  ;;  %v371_v4 = vld [vmem:[#allocation8] sm:$0xff]   ;;  %v369_v5 = vld [vmem:[#allocation6 + $0x10] sm:$0xff]   ;;  %v372_v6 = vld [vmem:[#allocation8 + $0x8] sm:$0xff]   ;;  %vm110_vm1 = vcmask 523264   ;;  %v476_v20 = vmov 0   ;;  %vm292_vm2 = vcmask 57344  }
  0x3b   :  { %345 = vmatprep.subr.bf16.mxu1 %v474_v1  ;;  %353 = vmatprep.mubr.msk.bf16.mxu1 %vm475_vm0, %v474_v1  ;;  %v370_v7 = vld [vmem:[#allocation6 + $0x18] sm:$0xff]   ;;  %v373_v10 = vld [vmem:[#allocation8 + $0x10] sm:$0xff]   ;;  %v288_v33 = vshrl.u32 %v287_v32, 7 }
  0x3c   :  { %334 = vmatpush3.bf16.msra.mxu0 %v367_v2  ;;  %346 = vmatpush3.bf16.msra.mxu1 %v371_v4  ;;  %v69_v8 = vld [vmem:[#allocation3] sm:$0xff]  ;;  %v310_v12 = vld [vmem:[%s586_s2] ss:$0 sm:$0xff] }
  0x3d   :  { %335 = vmatprep.subr.bf16.mxu0 %v474_v1  ;;  %347 = vmatprep.subr.bf16.mxu1 %v474_v1  ;;  %v70_v9 = vpack.c.bf16 %v69_v8, %v69_v8  ;;  %v374_v11 = vld [vmem:[#allocation8 + $0x18] sm:$0xff]   ;;  %v316_v21 = vld [vmem:[%s588_s4] ss:$0 sm:$0xff]  ;;  %v289_v34 = vsub.s32 0, %v288_v33  ;;  %s477_s4 = smov [#allocation9]  }
  0x3e   :  { %366 = vset.pattern.permute.xlu0 %v476_v20  ;;  %v322_v26 = vld [vmem:[%s589_s5] ss:$0 sm:$0xff]  ;;  %s300_s18 = sshll.u32 %s477_s4, 4  ;;  %s301_s18 = int_to_ptr.vmem [resolvable:$true] %s300_s18 }
  0x3f   :  { %v281_v30 = vld [vmem:[#allocation2] sm:$0x1]  ;;  %s441_s5 = scalar_lea.vmem %s301_s18, 16  ;;  %s445_s19 = scalar_lea.vmem %s301_s18, 32 }
  0x40   :  { %336 = vmatpush3.bf16.msra.mxu0 %v368_v3  ;;  %348 = vmatpush3.bf16.msra.mxu1 %v372_v6  ;;  %p442_p10 = scmp.ne.s32.totalorder %s301_s18, %s441_s5  ;;  %p446_p11 = scmp.lt.s32.totalorder %s301_s18, %s301_s18 }
  0x41   :  { %337 = vmatprep.subr.bf16.mxu0 %v474_v1  ;;  %349 = vmatprep.subr.bf16.mxu1 %v474_v1  ;;  %p447_p12 = scmp.lt.s32.totalorder %s445_s19, %s441_s5 }
  0x43   :  { %p448_p13 = por %p447_p12, %p446_p11 }
  0x44   :  { %338 = vmatpush3.bf16.msra.mxu0 %v369_v5  ;;  %350 = vmatpush3.bf16.msra.mxu1 %v373_v10 }
  0x45   :  { %339 = vmatprep.subr.bf16.mxu0 %v474_v1  ;;  %351 = vmatprep.subr.bf16.mxu1 %v474_v1  ;;  %p449_p0 = pnand %p448_p13, %p442_p10 }
  0x48   :  { %340 = vmatpush3.bf16.msra.mxu0 %v370_v7  ;;  %352 = vmatpush3.bf16.msra.mxu1 %v374_v11 }
  0x4b   :  { %342 = vmatmul.mubr.msk.bf16.vlgmr.msra.gmra.mrb[0].mxu0 %vm110_vm1, %v70_v9 }
 0x11e   :  { %v148_v13 = vpop.f32.mrb[0].mxu0 }
 0x11f   :  { %v149_v14 = vadd.f32 %v310_v12, %v148_v13  ;;  %v343_v15 = vpop.f32.mrb[1].mxu0 }
 0x120   :  { %v151_v16 = vpop.f32.mrb[2].mxu0 }
 0x121   :  { %v154_v17 = vmax.f32 %v149_v14, 0.0  ;;  %v344_v18 = vpop.f32.mrb[3].mxu0 }
 0x123   :  { %v155_v19 = vpack.c.bf16 %v154_v17, %v154_v17 }
 0x125   :  { %354 = vmatmul.mubr.msk.bf16.vlgmr.msra.gmra.mrb[0].mxu1 %vm110_vm1, %v155_v19 }
 0x1f8   :  { %v232_v22 = vpop.f32.mrb[0].mxu1 }
 0x1f9   :  { %v233_v23 = vadd.f32 %v316_v21, %v232_v22  ;;  %v355_v24 = vpop.f32.mrb[1].mxu1 }
 0x1fa   :  { %v235_v25 = vpop.f32.mrb[2].mxu1 }
 0x1fb   :  { %v238_v27 = vmax.f32 %v233_v23, 0.0  ;;  %v356_v28 = vpop.f32.mrb[3].mxu1 }
 0x1fd   :  { %v246_v29 = vmul.f32 %v322_v26, %v238_v27 }
 0x1ff   :  { %247 = vadd.xlane.f32.xlu0 %v246_v29 }
 0x215   :  { %284 = vperm.xlu0 %366, %v281_v30  }
 0x28c   :  { %v248_v31 = vpop.xlane.xlu0 %247 }
 0x28d   :  { %249 = vxpose.xlu1.b32.start.end [1/1] (short) (narrow) %v248_v31, 8 }
 0x294   :  { %v285_v35 = vpop.permute.xlu0 %284 }
 0x295   :  { %v290_v36 = vrot.slane %v285_v35, %v289_v34 }
 0x30d   :  { %v265_v37 = vpop.trf.xlu1 }
 0x30e   :  { %v291_v38 = vadd.f32 %v290_v36, %v265_v37 }
 0x310   :  { %293 = vst.msk [vmem:[#allocation9] sm:$0x1] %vm292_vm2, %v291_v38 }
 0x311   :  { %452 = shalt.err (!%p449_p0)
}
 0x312   :  { %s453_s22 = scalar_lea.hbm %s591_s7, 16 }
 0x313   :  { %p454_p1 = scmp.ne.s32.totalorder %s591_s7, %s453_s22  ;;  %p457_p2 = scmp.lt.u32.totalorder %s453_s22, %s591_s7 }
 0x315   :  { %p459_p3 = pnand %p457_p2, %p454_p1 }
 0x317   :  { %462 = shalt.err (!%p459_p3)
}
 0x318   :  { %303 = dma.vmem_to_hbm [thread:$0]  %s301_s18, 16, %s591_s7, [#allocation5]  }
 0x319   :  { %467 = dma.done.wait [#allocation5], 16  }
 0x31a   :  { %468 = vsyncadd [#allocation5], 4294967280 }
 0x31b   :  { %307 = vsyncpa [#allocation4], 1 }
 0x31c   :  { %308 = vsyncpa [#allocation7], 1 }
 0x31d   :  { %309 = vsyncpa [#allocation5], 1 }

</bundles_post_ra>
